<compile_context>
chip_gen: v6e
topology: v6e:2x2x1
jax: 0.10.0
libtpu: 0.0.40
codegen_flags: <defaults>
</compile_context>

<pallas_src>
import jax
import jax.numpy as jnp
from jax.experimental import pallas as pl
from jax.experimental.pallas import tpu as pltpu

BN_EPS = 1e-5


def _round_up(n, m):
    return (n + m - 1) // m * m


def _device_config():
    """Per-generation choices: elementwise dtype and a VMEM-limit cap."""
    try:
        kind = jax.devices()[0].device_kind.lower()
    except Exception:
        kind = ""
    if ("v6" in kind) or ("v7" in kind) or ("7x" in kind):
        # v6e/v7x have bf16 VALUs; v7x only has 64 MiB physical VMEM per core.
        cap = 56 * 2**20 if (("v7" in kind) or ("7x" in kind)) else 100 * 2**20
        return jnp.bfloat16, cap
    # v5e and older: no bf16 VPU -> keep elementwise math in f32.
    return jnp.float32, 100 * 2**20


def _make_kernel(*, batch, tile_b, act_dtype):
    """Build the 3-phase kernel with batch size / tile size baked in."""
    TB = tile_b
    inv_n = 1.0 / float(batch)

    def kernel(x_ref, w1_ref, ws_ref, vec_ref, out_ref, h1_ref, h4_ref, bn_ref):
        p = pl.program_id(0)          # phase: 0=BN1 stats, 1=BN1 apply+BN2 stats, 2=tail
        t = pl.program_id(1)          # batch tile
        off = pl.multiple_of(t * TB, TB)

        def mm(lhs_bf16, rhs_bf16):
            # bf16 MXU matmul with f32 accumulation.
            return jnp.dot(lhs_bf16, rhs_bf16, preferred_element_type=jnp.float32)

        def bias_relu(h_f32, b_row_f32):
            # bf16 elementwise on v6e/v7x (bf16 VALUs); f32 on v5e. Returns bf16
            # either way, ready for the next MXU matmul.
            if act_dtype == jnp.bfloat16:
                return jnp.maximum(
                    h_f32.astype(jnp.bfloat16) + b_row_f32.astype(jnp.bfloat16), 0)
            return jnp.maximum(h_f32 + b_row_f32, 0.0).astype(jnp.bfloat16)

        @pl.when((p == 0) & (t == 0))
        def _init():
            bn_ref[...] = jnp.zeros_like(bn_ref)

        # ---- Phase 0: Linear(F,128) + BN1 batch statistics -----------------
        @pl.when(p == 0)
        def _phase0():
            h1 = mm(x_ref[...], w1_ref[...])                     # (TB,128) f32
            # Padded batch rows of x are exactly zero and b1 is dropped, so
            # they contribute nothing to sum / sum-of-squares: no mask needed.
            bn_ref[0:1, :] += jnp.sum(h1, axis=0, keepdims=True)
            bn_ref[1:2, :] += jnp.sum(h1 * h1, axis=0, keepdims=True)
            h1_ref[pl.ds(off, TB), :] = h1.astype(jnp.bfloat16)

        # ---- Phase 1: apply BN1, layers 2-4, BN2 batch statistics ----------
        @pl.when(p == 1)
        def _phase1():
            mean1 = bn_ref[0:1, :] * inv_n
            var1 = bn_ref[1:2, :] * inv_n - mean1 * mean1        # single-pass var
            scale1 = jax.lax.rsqrt(var1 + BN_EPS) * vec_ref[0:1, :]   # * gamma1
            shift1 = vec_ref[1:2, :] - mean1 * scale1                 # beta1 - mean*scale

            h1 = h1_ref[pl.ds(off, TB), :].astype(jnp.float32)
            a1 = (h1 * scale1 + shift1).astype(jnp.bfloat16)     # BN1 (f32 math)

            h2 = bias_relu(mm(a1, ws_ref[0:128, :]), vec_ref[2:3, :])          # L2+ReLU
            h3 = bias_relu(mm(h2, ws_ref[128:256, 0:64]), vec_ref[3:4, 0:64])  # L3+ReLU
            h4 = mm(h3, ws_ref[256:320, 0:32])                   # (TB,32) f32; b4 cancelled
            h4_ref[pl.ds(off, TB), :] = h4

            # BN2 stats: padded rows are NOT zero here -> mask them out.
            rows = jax.lax.broadcasted_iota(jnp.int32, (TB, 1), 0)
            h4m = jnp.where(rows < (batch - t * TB), h4, 0.0)
            bn_ref[2:3, 0:32] += jnp.sum(h4m, axis=0, keepdims=True)
            bn_ref[3:4, 0:32] += jnp.sum(h4m * h4m, axis=0, keepdims=True)

        # ---- Phase 2: apply BN2, Linear(32,16)+ReLU, Linear(16,1), sigmoid --
        @pl.when(p == 2)
        def _phase2():
            mean2 = bn_ref[2:3, 0:32] * inv_n
            var2 = bn_ref[3:4, 0:32] * inv_n - mean2 * mean2
            scale2 = jax.lax.rsqrt(var2 + BN_EPS) * vec_ref[4:5, 0:32]
            shift2 = vec_ref[5:6, 0:32] - mean2 * scale2

            h4 = h4_ref[pl.ds(off, TB), :]                       # (TB,32) f32
            a2 = h4 * scale2 + shift2                            # BN2 (f32 math)
            # One small XLU transpose so the tail (and the output store) is
            # lane-dense: (TB,32) -> (32,TB).
            a2t = jnp.transpose(a2).astype(jnp.bfloat16)

            h5t = mm(ws_ref[320:336, 0:32], a2t)                 # (16,TB) = w5^T @ a2^T
            h5t = jnp.maximum(h5t + vec_ref[8:24, 0:1], 0.0)     # + b5 column, ReLU
            logits = jnp.sum(h5t * vec_ref[8:24, 1:2], axis=0,   # Linear(16,1) on VPU/XLU
                             keepdims=True) + vec_ref[6:7, 0:1]  # (1,TB)
            # Sigmoid via tanh identity: one EUP op, numerically robust.
            out_ref[...] = (0.5 * jnp.tanh(0.5 * logits) + 0.5).reshape(1, 1, TB)

    return kernel


def pack_params(params):
    """Pack weights into MXU-friendly slabs.

    ws (bf16):
      rows   0:128 -> w2  (128,128)
      rows 128:256 -> w3  (128, 64)  lanes 0:64
      rows 256:320 -> w4  ( 64, 32)  lanes 0:32
      rows 320:336 -> w5^T( 16, 32)  lanes 0:32   (transposed for lane-dense tail)
    vec (f32, (24,128)):
      row 0 g1, row 1 be1, row 2 b2, row 3 b3[:64], row 4 g2[:32], row 5 be2[:32],
      row 6 lane 0 = b6; rows 8:24 lane 0 = b5 (column), lane 1 = w6 (column).

    b1 / b4 are intentionally omitted: a per-feature bias feeding directly into
    training-mode BatchNorm is exactly cancelled by the mean subtraction.
    """
    w1 = params["w1"].astype(jnp.bfloat16)
    ws = jnp.concatenate([
        params["w2"],
        jnp.pad(params["w3"], ((0, 0), (0, 64))),
        jnp.pad(params["w4"], ((0, 0), (0, 96))),
        jnp.pad(params["w5"].T, ((0, 0), (0, 96))),
    ], axis=0).astype(jnp.bfloat16)                              # (336, 128)

    vec = jnp.zeros((24, 128), jnp.float32)
    vec = vec.at[0, :].set(params["g1"].reshape(-1))
    vec = vec.at[1, :].set(params["be1"].reshape(-1))
    vec = vec.at[2, :].set(params["b2"].reshape(-1))
    vec = vec.at[3, :64].set(params["b3"].reshape(-1))
    vec = vec.at[4, :32].set(params["g2"].reshape(-1))
    vec = vec.at[5, :32].set(params["be2"].reshape(-1))
    vec = vec.at[6, 0].set(params["b6"].reshape(()))
    vec = vec.at[8:24, 0].set(params["b5"].reshape(-1))
    vec = vec.at[8:24, 1].set(params["w6"].reshape(-1))
    return w1, ws, vec


def lol_result_model_forward(x, params, *, tile_b=None):
    B, F = x.shape
    act_dtype, vmem_cap = _device_config()

    if tile_b is None:
        tile_b = min(512, _round_up(B, 16))
    tile_b = _round_up(int(tile_b), 16)
    B_pad = _round_up(B, tile_b)
    nt = B_pad // tile_b
    assert B_pad % tile_b == 0

    # bf16 cast fused with the batch pad in one XLA fusion (no separate f32 pad
    # pass over x).  Padded rows are exact zeros -> BN1 stats stay exact.
    x_p = jnp.pad(x.astype(jnp.bfloat16), ((0, B_pad - B), (0, 0)))

    w1, ws, vec = pack_params(params)
    kernel = _make_kernel(batch=B, tile_b=tile_b, act_dtype=act_dtype)

    # x is only needed in phase 0; park its block index afterwards so it is
    # DMA'd from HBM exactly once.  Same trick for the output (phase 2 only).
    x_spec = pl.BlockSpec((tile_b, F),
                          lambda p, t, _nt=nt: (jnp.where(p == 0, t, _nt - 1), 0))
    out_spec = pl.BlockSpec((1, 1, tile_b),
                            lambda p, t: (jnp.where(p == 2, t, 0), 0, 0))

    # Explicit VMEM budget with headroom (capped per generation above).
    scratch_bytes = B_pad * 128 * 2 + B_pad * 32 * 4 + 8 * 128 * 4
    weight_bytes = (w1.size + ws.size) * 2 + vec.size * 4
    io_bytes = 4 * tile_b * 128 * 2 + 4 * tile_b * 128 * 4
    vmem_limit = int(min(vmem_cap,
                         scratch_bytes + weight_bytes + io_bytes + 16 * 2**20))

    out = pl.pallas_call(
        kernel,
        out_shape=jax.ShapeDtypeStruct((nt, 1, tile_b), jnp.float32),
        grid=(3, nt),
        in_specs=[
            x_spec,
            pl.BlockSpec(memory_space=pltpu.VMEM),   # w1 (F,128) bf16
            pl.BlockSpec(memory_space=pltpu.VMEM),   # ws (336,128) bf16 slab
            pl.BlockSpec(memory_space=pltpu.VMEM),   # vec (24,128) f32 slab
        ],
        out_specs=out_spec,
        scratch_shapes=[
            pltpu.VMEM((B_pad, 128), jnp.bfloat16),  # h1 (pre-BN1), persists across phases
            pltpu.VMEM((B_pad, 32), jnp.float32),    # h4 (pre-BN2)
            pltpu.VMEM((4, 128), jnp.float32),       # BN sum / sum-of-squares accumulators
        ],
        compiler_params=pltpu.CompilerParams(
            dimension_semantics=("arbitrary", "arbitrary"),
            vmem_limit_bytes=vmem_limit),
    )(x_p, w1, ws, vec)

    return out.reshape(B_pad)[:B].reshape(B, 1)


def init_params(key, in_feature):
    """Deterministic PyTorch-like init. Linear weights stored pre-transposed (in, out)."""
    dims = [(in_feature, 128), (128, 128), (128, 64), (64, 32), (32, 16), (16, 1)]
    params = {}
    keys = jax.random.split(key, len(dims) * 2)
    for i, (fan_in, fan_out) in enumerate(dims):
        bound = 1.0 / jnp.sqrt(fan_in)
        params[f"w{i + 1}"] = jax.random.uniform(
            keys[2 * i], (fan_in, fan_out), minval=-bound, maxval=bound, dtype=jnp.float32)
        params[f"b{i + 1}"] = jax.random.uniform(
            keys[2 * i + 1], (1, fan_out), minval=-bound, maxval=bound, dtype=jnp.float32)
    # BatchNorm affine params (gamma=1, beta=0, like a fresh nn.BatchNorm1d).
    params["g1"] = jnp.ones((1, 128), jnp.float32)
    params["be1"] = jnp.zeros((1, 128), jnp.float32)
    params["g2"] = jnp.ones((1, 32), jnp.float32)
    params["be2"] = jnp.zeros((1, 32), jnp.float32)
    return params


def reference_forward(x, params):
    """Pure-JAX f32 reference of the original module (training-mode BN)."""
    def bn(h, g, be):
        m = jnp.mean(h, axis=0, keepdims=True)
        v = jnp.mean((h - m) ** 2, axis=0, keepdims=True)
        return (h - m) / jnp.sqrt(v + BN_EPS) * g + be

    h = x @ params["w1"] + params["b1"]
    h = bn(h, params["g1"], params["be1"])
    h = jnp.maximum(h @ params["w2"] + params["b2"], 0.0)
    h = jnp.maximum(h @ params["w3"] + params["b3"], 0.0)
    h = h @ params["w4"] + params["b4"]
    h = bn(h, params["g2"], params["be2"])
    h = jnp.maximum(h @ params["w5"] + params["b5"], 0.0)
    h = h @ params["w6"] + params["b6"]
    return 1.0 / (1.0 + jnp.exp(-h))


if __name__ == "__main__":
    key = jax.random.PRNGKey(0)
    k_x, k_p, k_x2, k_p2 = jax.random.split(key, 4)

    # Case 1: the module's natural small shape (single batch tile).
    IN_FEATURE, BATCH = 32, 8
    x = jax.random.normal(k_x, (BATCH, IN_FEATURE), dtype=jnp.float32)
    params = init_params(k_p, IN_FEATURE)
    out = jax.block_until_ready(lol_result_model_forward(x, params))
    ref = reference_forward(x, params)
    assert out.shape == (BATCH, 1), out.shape
    assert bool(jnp.all(jnp.isfinite(out))), "non-finite output"
    assert bool(jnp.all((out >= 0.0) & (out <= 1.0))), "sigmoid range violated"
    assert bool(jnp.allclose(out, ref, atol=2e-2)), (out, ref)

    # Case 2: multi-tile batch with padding (exercises masked BN stats +
    # cross-tile stat accumulation + lane-dense tiled output).
    B2, F2 = 100, 20
    x2 = jax.random.normal(k_x2, (B2, F2), dtype=jnp.float32)
    params2 = init_params(k_p2, F2)
    out2 = jax.block_until_ready(lol_result_model_forward(x2, params2, tile_b=32))
    ref2 = reference_forward(x2, params2)
    assert out2.shape == (B2, 1), out2.shape
    assert bool(jnp.all(jnp.isfinite(out2))), "non-finite output (tiled)"
    assert bool(jnp.allclose(out2, ref2, atol=2e-2)), float(jnp.max(jnp.abs(out2 - ref2)))

    print("KERNEL_OK")
</pallas_src>

<mosaic_0001>
module attributes {stable_mosaic.version = 11 : i64} {
  func.func @kernel(%arg0: i32, %arg1: i32, %arg2: memref<16x32xbf16, #tpu.memory_space<vmem>>, %arg3: memref<32x128xbf16, #tpu.memory_space<vmem>>, %arg4: memref<336x128xbf16, #tpu.memory_space<vmem>>, %arg5: memref<24x128xf32, #tpu.memory_space<vmem>>, %arg6: memref<1x1x16xf32, #tpu.memory_space<vmem>>, %arg7: memref<16x128xbf16, #tpu.memory_space<vmem>>, %arg8: memref<16x32xf32, #tpu.memory_space<vmem>>, %arg9: memref<4x128xf32, #tpu.memory_space<vmem>>) attributes {dimension_semantics = [#tpu.dimension_semantics<arbitrary>, #tpu.dimension_semantics<arbitrary>], iteration_bounds = array<i64: 3, 1>, scalar_prefetch = 0 : i64, scratch_operands = 3 : i64, tpu.core_type = #tpu.core_type<tc>, window_params = [{transform_indices = @transform_0, window_bounds = array<i64: 16, 32>}, {pipeline_mode = #tpu.pipeline_mode<synchronous>, transform_indices = @transform_1, window_bounds = array<i64: 32, 128>}, {pipeline_mode = #tpu.pipeline_mode<synchronous>, transform_indices = @transform_2, window_bounds = array<i64: 336, 128>}, {pipeline_mode = #tpu.pipeline_mode<synchronous>, transform_indices = @transform_3, window_bounds = array<i64: 24, 128>}, {transform_indices = @transform_4, window_bounds = array<i64: 1, 1, 16>}]} {
    %c16_i32 = arith.constant 16 : i32
    %0 = arith.muli %arg1, %c16_i32 : i32
    %1 = tpu.assume_multiple %0, 16 : i32
    %c0_i32 = arith.constant 0 : i32
    %2 = arith.cmpi eq, %arg0, %c0_i32 : i32
    %c0_i32_0 = arith.constant 0 : i32
    %3 = arith.cmpi eq, %arg1, %c0_i32_0 : i32
    %4 = arith.andi %2, %3 : i1
    %5 = arith.extui %4 : i1 to i32
    %c0_i32_1 = arith.constant 0 : i32
    %6 = arith.cmpi ne, %5, %c0_i32_1 : i32
    scf.if %6 {
      %cst = arith.constant 0.000000e+00 : f32
      %16 = vector.broadcast %cst : f32 to vector<4x128xf32>
      %c0 = arith.constant 0 : index
      %c0_6 = arith.constant 0 : index
      %17 = vector.load %arg9[%c0, %c0_6] : memref<4x128xf32, #tpu.memory_space<vmem>>, vector<4x128xf32>
      tpu.vector_store %arg9[%c0, %c0_6], %16 {strides = array<i32>} : memref<4x128xf32, #tpu.memory_space<vmem>>, vector<4x128xf32>,
    } else {
    }
    %c0_i32_2 = arith.constant 0 : i32
    %7 = arith.cmpi eq, %arg0, %c0_i32_2 : i32
    %8 = arith.extui %7 : i1 to i32
    %c0_i32_3 = arith.constant 0 : i32
    %9 = arith.cmpi ne, %8, %c0_i32_3 : i32
    scf.if %9 {
      %c0 = arith.constant 0 : index
      %c0_6 = arith.constant 0 : index
      %16 = vector.load %arg2[%c0, %c0_6] : memref<16x32xbf16, #tpu.memory_space<vmem>>, vector<16x32xbf16>
      %c0_7 = arith.constant 0 : index
      %c0_8 = arith.constant 0 : index
      %17 = vector.load %arg3[%c0_7, %c0_8] : memref<32x128xbf16, #tpu.memory_space<vmem>>, vector<32x128xbf16>
      %cst = arith.constant dense<0.000000e+00> : vector<16x128xf32>
      %18 = tpu.matmul %16, %17, %cst {dimension_numbers = #tpu.dot_dimension_numbers<[1], [0], [0], [1], [0, 0, 1, 1], [], []>} : vector<16x32xbf16>, vector<32x128xbf16>, vector<16x128xf32> -> vector<16x128xf32>
      %c0_9 = arith.constant 0 : index
      %c0_10 = arith.constant 0 : index
      %19 = vector.load %arg9[%c0_9, %c0_10] : memref<4x128xf32, #tpu.memory_space<vmem>>, vector<1x128xf32>
      %cst_11 = arith.constant dense<0.000000e+00> : vector<128xf32>
      %20 = vector.multi_reduction <add>, %18, %cst_11 [0] : vector<16x128xf32> to vector<128xf32>
      %21 = vector.shape_cast %20 : vector<128xf32> to vector<1x128xf32>
      %22 = arith.addf %19, %21 : vector<1x128xf32>
      %c0_12 = arith.constant 0 : index
      %c0_13 = arith.constant 0 : index
      %23 = vector.load %arg9[%c0_12, %c0_13] : memref<4x128xf32, #tpu.memory_space<vmem>>, vector<1x128xf32>
      tpu.vector_store %arg9[%c0_12, %c0_13], %22 {strides = array<i32>} : memref<4x128xf32, #tpu.memory_space<vmem>>, vector<1x128xf32>,
      %c1 = arith.constant 1 : index
      %c0_14 = arith.constant 0 : index
      %24 = vector.load %arg9[%c1, %c0_14] : memref<4x128xf32, #tpu.memory_space<vmem>>, vector<1x128xf32>
      %25 = arith.mulf %18, %18 : vector<16x128xf32>
      %cst_15 = arith.constant dense<0.000000e+00> : vector<128xf32>
      %26 = vector.multi_reduction <add>, %25, %cst_15 [0] : vector<16x128xf32> to vector<128xf32>
      %27 = vector.shape_cast %26 : vector<128xf32> to vector<1x128xf32>
      %28 = arith.addf %24, %27 : vector<1x128xf32>
      %c1_16 = arith.constant 1 : index
      %c0_17 = arith.constant 0 : index
      %29 = vector.load %arg9[%c1_16, %c0_17] : memref<4x128xf32, #tpu.memory_space<vmem>>, vector<1x128xf32>
      tpu.vector_store %arg9[%c1_16, %c0_17], %28 {strides = array<i32>} : memref<4x128xf32, #tpu.memory_space<vmem>>, vector<1x128xf32>,
      %30 = arith.truncf %18 : vector<16x128xf32> to vector<16x128xbf16>
      %31 = arith.index_cast %1 : i32 to index
      %c0_18 = arith.constant 0 : index
      %32 = vector.load %arg7[%31, %c0_18] : memref<16x128xbf16, #tpu.memory_space<vmem>>, vector<16x128xbf16>
      tpu.vector_store %arg7[%31, %c0_18], %30 {strides = array<i32>} : memref<16x128xbf16, #tpu.memory_space<vmem>>, vector<16x128xbf16>,
    } else {
    }
    %c1_i32 = arith.constant 1 : i32
    %10 = arith.cmpi eq, %arg0, %c1_i32 : i32
    %11 = arith.extui %10 : i1 to i32
    %c0_i32_4 = arith.constant 0 : i32
    %12 = arith.cmpi ne, %11, %c0_i32_4 : i32
    scf.if %12 {
      %c0 = arith.constant 0 : index
      %c0_6 = arith.constant 0 : index
      %16 = vector.load %arg9[%c0, %c0_6] : memref<4x128xf32, #tpu.memory_space<vmem>>, vector<1x128xf32>
      %cst = arith.constant 1.250000e-01 : f32
      %17 = vector.broadcast %cst : f32 to vector<1x128xf32>
      %18 = arith.mulf %16, %17 : vector<1x128xf32>
      %c1 = arith.constant 1 : index
      %c0_7 = arith.constant 0 : index
      %19 = vector.load %arg9[%c1, %c0_7] : memref<4x128xf32, #tpu.memory_space<vmem>>, vector<1x128xf32>
      %cst_8 = arith.constant 1.250000e-01 : f32
      %20 = vector.broadcast %cst_8 : f32 to vector<1x128xf32>
      %21 = arith.mulf %19, %20 : vector<1x128xf32>
      %22 = arith.mulf %18, %18 : vector<1x128xf32>
      %23 = arith.subf %21, %22 : vector<1x128xf32>
      %cst_9 = arith.constant 9.99999974E-6 : f32
      %24 = vector.broadcast %cst_9 : f32 to vector<1x128xf32>
      %25 = arith.addf %23, %24 : vector<1x128xf32>
      %26 = math.rsqrt %25 : vector<1x128xf32>
      %c0_10 = arith.constant 0 : index
      %c0_11 = arith.constant 0 : index
      %27 = vector.load %arg5[%c0_10, %c0_11] : memref<24x128xf32, #tpu.memory_space<vmem>>, vector<1x128xf32>
      %28 = arith.mulf %26, %27 : vector<1x128xf32>
      %c1_12 = arith.constant 1 : index
      %c0_13 = arith.constant 0 : index
      %29 = vector.load %arg5[%c1_12, %c0_13] : memref<24x128xf32, #tpu.memory_space<vmem>>, vector<1x128xf32>
      %30 = arith.mulf %18, %28 : vector<1x128xf32>
      %31 = arith.subf %29, %30 : vector<1x128xf32>
      %32 = arith.index_cast %1 : i32 to index
      %c0_14 = arith.constant 0 : index
      %33 = vector.load %arg7[%32, %c0_14] : memref<16x128xbf16, #tpu.memory_space<vmem>>, vector<16x128xbf16>
      %34 = arith.extf %33 : vector<16x128xbf16> to vector<16x128xf32>
      %35 = vector.broadcast %28 : vector<1x128xf32> to vector<16x128xf32>
      %36 = arith.mulf %34, %35 : vector<16x128xf32>
      %37 = vector.broadcast %31 : vector<1x128xf32> to vector<16x128xf32>
      %38 = arith.addf %36, %37 : vector<16x128xf32>
      %39 = arith.truncf %38 : vector<16x128xf32> to vector<16x128xbf16>
      %c0_15 = arith.constant 0 : index
      %c0_16 = arith.constant 0 : index
      %40 = vector.load %arg4[%c0_15, %c0_16] : memref<336x128xbf16, #tpu.memory_space<vmem>>, vector<128x128xbf16>
      %cst_17 = arith.constant dense<0.000000e+00> : vector<16x128xf32>
      %41 = tpu.matmul %39, %40, %cst_17 {dimension_numbers = #tpu.dot_dimension_numbers<[1], [0], [0], [1], [0, 0, 1, 1], [], []>} : vector<16x128xbf16>, vector<128x128xbf16>, vector<16x128xf32> -> vector<16x128xf32>
      %c2 = arith.constant 2 : index
      %c0_18 = arith.constant 0 : index
      %42 = vector.load %arg5[%c2, %c0_18] : memref<24x128xf32, #tpu.memory_space<vmem>>, vector<1x128xf32>
      %43 = vector.broadcast %42 : vector<1x128xf32> to vector<16x128xf32>
      %44 = arith.addf %41, %43 : vector<16x128xf32>
      %cst_19 = arith.constant 0.000000e+00 : f32
      %45 = vector.broadcast %cst_19 : f32 to vector<16x128xf32>
      %46 = arith.maximumf %44, %45 : vector<16x128xf32>
      %47 = arith.truncf %46 : vector<16x128xf32> to vector<16x128xbf16>
      %c128 = arith.constant 128 : index
      %c0_20 = arith.constant 0 : index
      %48 = vector.load %arg4[%c128, %c0_20] : memref<336x128xbf16, #tpu.memory_space<vmem>>, vector<128x64xbf16>
      %cst_21 = arith.constant dense<0.000000e+00> : vector<16x64xf32>
      %49 = tpu.matmul %47, %48, %cst_21 {dimension_numbers = #tpu.dot_dimension_numbers<[1], [0], [0], [1], [0, 0, 1, 1], [], []>} : vector<16x128xbf16>, vector<128x64xbf16>, vector<16x64xf32> -> vector<16x64xf32>
      %c3 = arith.constant 3 : index
      %c0_22 = arith.constant 0 : index
      %50 = vector.load %arg5[%c3, %c0_22] : memref<24x128xf32, #tpu.memory_space<vmem>>, vector<1x64xf32>
      %51 = vector.broadcast %50 : vector<1x64xf32> to vector<16x64xf32>
      %52 = arith.addf %49, %51 : vector<16x64xf32>
      %cst_23 = arith.constant 0.000000e+00 : f32
      %53 = vector.broadcast %cst_23 : f32 to vector<16x64xf32>
      %54 = arith.maximumf %52, %53 : vector<16x64xf32>
      %55 = arith.truncf %54 : vector<16x64xf32> to vector<16x64xbf16>
      %c256 = arith.constant 256 : index
      %c0_24 = arith.constant 0 : index
      %56 = vector.load %arg4[%c256, %c0_24] : memref<336x128xbf16, #tpu.memory_space<vmem>>, vector<64x32xbf16>
      %cst_25 = arith.constant dense<0.000000e+00> : vector<16x32xf32>
      %57 = tpu.matmul %55, %56, %cst_25 {dimension_numbers = #tpu.dot_dimension_numbers<[1], [0], [0], [1], [0, 0, 1, 1], [], []>} : vector<16x64xbf16>, vector<64x32xbf16>, vector<16x32xf32> -> vector<16x32xf32>
      %58 = arith.index_cast %1 : i32 to index
      %c0_26 = arith.constant 0 : index
      %59 = vector.load %arg8[%58, %c0_26] : memref<16x32xf32, #tpu.memory_space<vmem>>, vector<16x32xf32>
      tpu.vector_store %arg8[%58, %c0_26], %57 {strides = array<i32>} : memref<16x32xf32, #tpu.memory_space<vmem>>, vector<16x32xf32>,
      %60 = tpu.iota {dimensions = array<i32: 0>} : vector<16x1xi32>
      %c16_i32_27 = arith.constant 16 : i32
      %61 = arith.muli %arg1, %c16_i32_27 : i32
      %c8_i32 = arith.constant 8 : i32
      %62 = arith.subi %c8_i32, %61 : i32
      %63 = vector.broadcast %62 : i32 to vector<16x1xi32>
      %64 = arith.cmpi slt, %60, %63 : vector<16x1xi32>
      %cst_28 = arith.constant 0.000000e+00 : f32
      %65 = vector.shape_cast %64 : vector<16x1xi1> to vector<16x1xi1>
      %66 = vector.broadcast %65 : vector<16x1xi1> to vector<16x32xi1>
      %67 = vector.broadcast %cst_28 : f32 to vector<16x32xf32>
      %68 = arith.select %66, %57, %67 : vector<16x32xi1>, vector<16x32xf32>
      %c2_29 = arith.constant 2 : index
      %c0_30 = arith.constant 0 : index
      %69 = vector.load %arg9[%c2_29, %c0_30] : memref<4x128xf32, #tpu.memory_space<vmem>>, vector<1x32xf32>
      %cst_31 = arith.constant dense<0.000000e+00> : vector<32xf32>
      %70 = vector.multi_reduction <add>, %68, %cst_31 [0] : vector<16x32xf32> to vector<32xf32>
      %71 = vector.shape_cast %70 : vector<32xf32> to vector<1x32xf32>
      %72 = arith.addf %69, %71 : vector<1x32xf32>
      %c2_32 = arith.constant 2 : index
      %c0_33 = arith.constant 0 : index
      %73 = vector.load %arg9[%c2_32, %c0_33] : memref<4x128xf32, #tpu.memory_space<vmem>>, vector<1x32xf32>
      tpu.vector_store %arg9[%c2_32, %c0_33], %72 {strides = array<i32>} : memref<4x128xf32, #tpu.memory_space<vmem>>, vector<1x32xf32>,
      %c3_34 = arith.constant 3 : index
      %c0_35 = arith.constant 0 : index
      %74 = vector.load %arg9[%c3_34, %c0_35] : memref<4x128xf32, #tpu.memory_space<vmem>>, vector<1x32xf32>
      %75 = arith.mulf %68, %68 : vector<16x32xf32>
      %cst_36 = arith.constant dense<0.000000e+00> : vector<32xf32>
      %76 = vector.multi_reduction <add>, %75, %cst_36 [0] : vector<16x32xf32> to vector<32xf32>
      %77 = vector.shape_cast %76 : vector<32xf32> to vector<1x32xf32>
      %78 = arith.addf %74, %77 : vector<1x32xf32>
      %c3_37 = arith.constant 3 : index
      %c0_38 = arith.constant 0 : index
      %79 = vector.load %arg9[%c3_37, %c0_38] : memref<4x128xf32, #tpu.memory_space<vmem>>, vector<1x32xf32>
      tpu.vector_store %arg9[%c3_37, %c0_38], %78 {strides = array<i32>} : memref<4x128xf32, #tpu.memory_space<vmem>>, vector<1x32xf32>,
    } else {
    }
    %c2_i32 = arith.constant 2 : i32
    %13 = arith.cmpi eq, %arg0, %c2_i32 : i32
    %14 = arith.extui %13 : i1 to i32
    %c0_i32_5 = arith.constant 0 : i32
    %15 = arith.cmpi ne, %14, %c0_i32_5 : i32
    scf.if %15 {
      %c2 = arith.constant 2 : index
      %c0 = arith.constant 0 : index
      %16 = vector.load %arg9[%c2, %c0] : memref<4x128xf32, #tpu.memory_space<vmem>>, vector<1x32xf32>
      %cst = arith.constant 1.250000e-01 : f32
      %17 = vector.broadcast %cst : f32 to vector<1x32xf32>
      %18 = arith.mulf %16, %17 : vector<1x32xf32>
      %c3 = arith.constant 3 : index
      %c0_6 = arith.constant 0 : index
      %19 = vector.load %arg9[%c3, %c0_6] : memref<4x128xf32, #tpu.memory_space<vmem>>, vector<1x32xf32>
      %cst_7 = arith.constant 1.250000e-01 : f32
      %20 = vector.broadcast %cst_7 : f32 to vector<1x32xf32>
      %21 = arith.mulf %19, %20 : vector<1x32xf32>
      %22 = arith.mulf %18, %18 : vector<1x32xf32>
      %23 = arith.subf %21, %22 : vector<1x32xf32>
      %cst_8 = arith.constant 9.99999974E-6 : f32
      %24 = vector.broadcast %cst_8 : f32 to vector<1x32xf32>
      %25 = arith.addf %23, %24 : vector<1x32xf32>
      %26 = math.rsqrt %25 : vector<1x32xf32>
      %c4 = arith.constant 4 : index
      %c0_9 = arith.constant 0 : index
      %27 = vector.load %arg5[%c4, %c0_9] : memref<24x128xf32, #tpu.memory_space<vmem>>, vector<1x32xf32>
      %28 = arith.mulf %26, %27 : vector<1x32xf32>
      %c5 = arith.constant 5 : index
      %c0_10 = arith.constant 0 : index
      %29 = vector.load %arg5[%c5, %c0_10] : memref<24x128xf32, #tpu.memory_space<vmem>>, vector<1x32xf32>
      %30 = arith.mulf %18, %28 : vector<1x32xf32>
      %31 = arith.subf %29, %30 : vector<1x32xf32>
      %32 = arith.index_cast %1 : i32 to index
      %c0_11 = arith.constant 0 : index
      %33 = vector.load %arg8[%32, %c0_11] : memref<16x32xf32, #tpu.memory_space<vmem>>, vector<16x32xf32>
      %34 = vector.broadcast %28 : vector<1x32xf32> to vector<16x32xf32>
      %35 = arith.mulf %33, %34 : vector<16x32xf32>
      %36 = vector.broadcast %31 : vector<1x32xf32> to vector<16x32xf32>
      %37 = arith.addf %35, %36 : vector<16x32xf32>
      %38 = tpu.transpose %37, [1, 0] : vector<16x32xf32> -> vector<32x16xf32>
      %39 = arith.truncf %38 : vector<32x16xf32> to vector<32x16xbf16>
      %c320 = arith.constant 320 : index
      %c0_12 = arith.constant 0 : index
      %40 = vector.load %arg4[%c320, %c0_12] : memref<336x128xbf16, #tpu.memory_space<vmem>>, vector<16x32xbf16>
      %cst_13 = arith.constant dense<0.000000e+00> : vector<16x16xf32>
      %41 = tpu.matmul %40, %39, %cst_13 {dimension_numbers = #tpu.dot_dimension_numbers<[1], [0], [0], [1], [0, 0, 1, 1], [], []>} : vector<16x32xbf16>, vector<32x16xbf16>, vector<16x16xf32> -> vector<16x16xf32>
      %c8 = arith.constant 8 : index
      %c0_14 = arith.constant 0 : index
      %42 = vector.load %arg5[%c8, %c0_14] : memref<24x128xf32, #tpu.memory_space<vmem>>, vector<16x1xf32>
      %43 = vector.broadcast %42 : vector<16x1xf32> to vector<16x16xf32>
      %44 = arith.addf %41, %43 : vector<16x16xf32>
      %cst_15 = arith.constant 0.000000e+00 : f32
      %45 = vector.broadcast %cst_15 : f32 to vector<16x16xf32>
      %46 = arith.maximumf %44, %45 : vector<16x16xf32>
      %c8_16 = arith.constant 8 : index
      %c1 = arith.constant 1 : index
      %47 = vector.load %arg5[%c8_16, %c1] : memref<24x128xf32, #tpu.memory_space<vmem>>, vector<16x1xf32>
      %48 = vector.broadcast %47 : vector<16x1xf32> to vector<16x16xf32>
      %49 = arith.mulf %46, %48 : vector<16x16xf32>
      %cst_17 = arith.constant dense<0.000000e+00> : vector<16xf32>
      %50 = vector.multi_reduction <add>, %49, %cst_17 [0] : vector<16x16xf32> to vector<16xf32>
      %51 = vector.shape_cast %50 : vector<16xf32> to vector<1x16xf32>
      %c6 = arith.constant 6 : index
      %c0_18 = arith.constant 0 : index
      %52 = vector.load %arg5[%c6, %c0_18] : memref<24x128xf32, #tpu.memory_space<vmem>>, vector<1x1xf32>
      %53 = vector.broadcast %52 : vector<1x1xf32> to vector<1x16xf32>
      %54 = arith.addf %51, %53 : vector<1x16xf32>
      %cst_19 = arith.constant 5.000000e-01 : f32
      %55 = vector.broadcast %cst_19 : f32 to vector<1x16xf32>
      %56 = arith.mulf %55, %54 : vector<1x16xf32>
      %57 = math.tanh %56 : vector<1x16xf32>
      %cst_20 = arith.constant 5.000000e-01 : f32
      %58 = vector.broadcast %cst_20 : f32 to vector<1x16xf32>
      %59 = arith.mulf %58, %57 : vector<1x16xf32>
      %cst_21 = arith.constant 5.000000e-01 : f32
      %60 = vector.broadcast %cst_21 : f32 to vector<1x16xf32>
      %61 = arith.addf %59, %60 : vector<1x16xf32>
      %62 = vector.shape_cast %61 : vector<1x16xf32> to vector<1x1x16xf32>
      %c0_22 = arith.constant 0 : index
      %c0_23 = arith.constant 0 : index
      %c0_24 = arith.constant 0 : index
      %63 = vector.load %arg6[%c0_22, %c0_23, %c0_24] : memref<1x1x16xf32, #tpu.memory_space<vmem>>, vector<1x1x16xf32>
      tpu.vector_store %arg6[%c0_22, %c0_23, %c0_24], %62 {strides = array<i32>} : memref<1x1x16xf32, #tpu.memory_space<vmem>>, vector<1x1x16xf32>,
    } else {
    }
    return
  }
  func.func @transform_0(%arg0: i32, %arg1: i32) -> (i32, i32) {
    %c0_i32 = arith.constant 0 : i32
    %0 = arith.cmpi eq, %arg0, %c0_i32 : i32
    %c0_i32_0 = arith.constant 0 : i32
    %1 = arith.select %0, %arg1, %c0_i32_0 : i32
    %c0_i32_1 = arith.constant 0 : i32
    %c0_i32_2 = arith.constant 0 : i32
    return %1, %c0_i32_1 : i32, i32
  }
  func.func @transform_1(%arg0: i32, %arg1: i32) -> (i32, i32) {
    %c0_i32 = arith.constant 0 : i32
    %c0_i32_0 = arith.constant 0 : i32
    %c0_i32_1 = arith.constant 0 : i32
    return %c0_i32, %c0_i32_0 : i32, i32
  }
  func.func @transform_2(%arg0: i32, %arg1: i32) -> (i32, i32) {
    %c0_i32 = arith.constant 0 : i32
    %c0_i32_0 = arith.constant 0 : i32
    %c0_i32_1 = arith.constant 0 : i32
    return %c0_i32, %c0_i32_0 : i32, i32
  }
  func.func @transform_3(%arg0: i32, %arg1: i32) -> (i32, i32) {
    %c0_i32 = arith.constant 0 : i32
    %c0_i32_0 = arith.constant 0 : i32
    %c0_i32_1 = arith.constant 0 : i32
    return %c0_i32, %c0_i32_0 : i32, i32
  }
  func.func @transform_4(%arg0: i32, %arg1: i32) -> (i32, i32, i32) {
    %c2_i32 = arith.constant 2 : i32
    %0 = arith.cmpi eq, %arg0, %c2_i32 : i32
    %c0_i32 = arith.constant 0 : i32
    %1 = arith.select %0, %arg1, %c0_i32 : i32
    %c0_i32_0 = arith.constant 0 : i32
    %c0_i32_1 = arith.constant 0 : i32
    %c0_i32_2 = arith.constant 0 : i32
    return %1, %c0_i32_0, %c0_i32_1 : i32, i32, i32
  }
}

</mosaic_0001>

<bundles_post_ra>
// kernel: tpu_custom_call.1
= control target key start
LH: loop header
LB: loop body
LE: loop exit
PB: predicated region body
PF: predicated region fallthrough
CT: control target
= control target key end

     0   :  { %9 = vsyncpa [#allocation6], 0  ;;  %s1728_s0 = inlined_call_operand.hbm [shape: bf16[16,32], index: 0, kind: input, shape index: {}]   ;;  %s1729_s1 = inlined_call_operand.hbm [shape: bf16[32,128], index: 1, kind: input, shape index: {}]   ;;  %s1730_s2 = inlined_call_operand.hbm [shape: bf16[336,128], index: 2, kind: input, shape index: {}]   ;;  %s1731_s3 = inlined_call_operand.hbm [shape: f32[24,128], index: 3, kind: input, shape index: {}]   ;;  %s1732_s4 = inlined_call_operand.hbm [shape: f32[1,1,16], index: 4, kind: output, shape index: {}]  }
   0x1   :  { %11 = vsyncpa [#allocation6 + $0x1], 0 }
   0x2   :  { %12 = vsyncpa [#allocation9], 0 }
   0x3   :  { %13 = vsyncpa [#allocation12], 0 }
   0x4   :  { %14 = vsyncpa [#allocation7], 0 }
   0x5   :  { %16 = vsyncpa [#allocation7 + $0x1], 0  ;;  %s1577_s15 = smov 0   ;;  %s1579_s16 = smov 0  }
   0x6   :  { %s1581_s17 = smov 0  }
   0x7 LB: > { %s1078_s18 = sadd.s32 4294967295, %s1532_s17   ;;  %s1079_s19 = sadd.s32 4294967294, %s1532_s17   ;;  %s1532_s17 = sphi %s1581_s17, %s22_s17   ;;  %s1528_s16 = sphi %s1579_s16, %s1738_s16   ;;  %s1524_s15 = sphi %s1577_s15, %s1737_s15  }
   0x8   : > { %s34_s20 = sadd.s32 1, %s1528_s16  ;;  %p1080_p0 = scmp.ge.s32.totalorder %s1532_s17, 1 }
   0x9   : > { %p36_p1 = scmp.ge.s32.totalorder %s34_s20, 3  ;;  %p162_p2 = scmp.lt.s32.totalorder %s1532_s17, 4 }
   0xa   : > { %p1599_p3 = scmp.eq.s32.totalorder %s1078_s18, 0  ;;  %s1534_s23 = smov [#allocation8]  }
   0xb   : > { %s1740_s20 = smov (%p36_p1, %s34_s20), 0  ;;  %p1605_p4 = pnand %p1080_p0, %p162_p2 }
   0xc   : > { %s174_s24 = sshll.u32 %s1534_s23, 4  ;;  %s1535_s26 = smov [#allocation10]   ;;  %s175_s24 = int_to_ptr.vmem [resolvable:$true] %s174_s24 }
   0xd   : > { %p1259_p5 = pneg %p1605_p4  ;;  %s187_s27 = sshll.u32 %s1535_s26, 4  ;;  %s188_s27 = int_to_ptr.vmem [resolvable:$true] %s187_s27 }
   0xe   : > { %s1377_s28 = scalar_lea.vmem %s175_s24, 256  ;;  %p1385_p11 = scmp.lt.s32.totalorder %s175_s24, %s175_s24 }
   0xf   : > { %p1613_p6 = pnand %p1599_p3, %p1259_p5  ;;  %p1378_p8 = scmp.ne.s32.totalorder %s175_s24, %s1377_s28 }
  0x10   : > { %p1386_p12 = scmp.lt.s32.totalorder %s1377_s28, %s1377_s28 }
  0x11   : > { %p1368_p7 = pneg %p1613_p6 }
  0x12   : > { %p1387_p13 = por %p1386_p12, %p1385_p11 }
  0x13   : > { %p1380_p9 = pnand %p1378_p8, %p1368_p7 }
  0x15   : > { %p1381_p10 = pneg %p1380_p9 }
  0x17   : > { %p1388_p0 = pnand %p1387_p13, %p1381_p10 }
  0x19   : > { %1391 = shalt.err (!%p1388_p0)
}
  0x1a   : > { %s1536_s29 = smov 64   ;;  %s1537_s30 = smov 4  }
  0x1b   : > { %1262 = dma.hbm_to_vmem [thread:$0]  (!%p1613_p6), %s1729_s1, 256, %s175_s24, [#allocation9], %s1536_s29, %s1536_s29, %s1537_s30  }
  0x1c   : > { %s1538_s7 = smov [#allocation11]   ;;  %s1403_s9 = scalar_lea.vmem %s188_s27, 2688 }
  0x1d   : > { %s200_s8 = sshll.u32 %s1538_s7, 4  ;;  %p1404_p1 = scmp.ne.s32.totalorder %s188_s27, %s1403_s9  ;;  %s201_s8 = int_to_ptr.vmem [resolvable:$true] %s200_s8 }
  0x1e   : > { %p1411_p8 = scmp.lt.s32.totalorder %s188_s27, %s188_s27  ;;  %p1412_p9 = scmp.lt.s32.totalorder %s1403_s9, %s1403_s9 }
  0x1f   : > { %p1406_p2 = pnand %p1404_p1, %p1368_p7 }
  0x20   : > { %p1413_p10 = por %p1412_p9, %p1411_p8 }
  0x21   : > { %p1407_p5 = pneg %p1406_p2 }
  0x23   : > { %p1414_p11 = pnand %p1413_p10, %p1407_p5 }
  0x25   : > { %1417 = shalt.err (!%p1414_p11)
}
  0x26   : > { %1265 = dma.hbm_to_vmem [thread:$0]  (!%p1613_p6), %s1730_s2, 2688, %s188_s27, [#allocation9], %s1536_s29, %s1536_s29, %s1537_s30  }
  0x27   : > { %p1280_p12 = scmp.lt.s32.totalorder %s1532_s17, 3  ;;  %s1429_s12 = scalar_lea.vmem %s201_s8, 384 }
  0x28   : > { %p1430_p13 = scmp.ne.s32.totalorder %s201_s8, %s1429_s12  ;;  %p1437_p2 = scmp.lt.s32.totalorder %s201_s8, %s201_s8 }
  0x29   : > { %p1438_p5 = scmp.lt.s32.totalorder %s1429_s12, %s1429_s12 }
  0x2a   : > { %p1432_p0 = pnand %p1430_p13, %p1368_p7 }
  0x2b   : > { %p1439_p8 = por %p1438_p5, %p1437_p2 }
  0x2c   : > { %p1433_p1 = pneg %p1432_p0 }
  0x2e   : > { %p1440_p9 = pnand %p1439_p8, %p1433_p1 }
  0x30   : > { %1443 = shalt.err (!%p1440_p9)
}
  0x31   : > { %s1539_s13 = smov 128   ;;  %s1540_s14 = smov 8  }
  0x32   : > { %1268 = dma.hbm_to_vmem [thread:$0]  (!%p1613_p6), %s1731_s3, 384, %s201_s8, [#allocation12], %s1539_s13, %s1539_s13, %s1540_s14  }
  0x33   : > { %p1281_p10 = scmp.eq.s32.totalorder %s1532_s17, 0  ;;  %s1541_s26 = smov [#allocation5]  }
  0x34   : > { %s227_s27 = sshll.u32 %s1541_s26, 4  ;;  %s228_s27 = int_to_ptr.vmem [resolvable:$true] %s227_s27 }
  0x35   : > { %p1270_p7 = pnand %p1281_p10, %p1280_p12  ;;  %s1455_s28 = scalar_lea.vmem %s228_s27, 128 }
  0x36   : > { %p1456_p13 = scmp.ne.s32.totalorder %s228_s27, %s1455_s28  ;;  %s1462_s5 = scalar_lea.vmem %s228_s27, 256 }
  0x37   : > { %p1446_p11 = pneg %p1270_p7  ;;  %p1463_p2 = scmp.lt.s32.totalorder %s228_s27, %s228_s27 }
  0x38   : > { %p1464_p5 = scmp.lt.s32.totalorder %s1462_s5, %s1455_s28 }
  0x39   : > { %p1458_p0 = pnand %p1456_p13, %p1446_p11 }
  0x3a   : > { %p1465_p8 = por %p1464_p5, %p1463_p2 }
  0x3b   : > { %p1459_p1 = pneg %p1458_p0 }
  0x3d   : > { %p1466_p9 = pnand %p1465_p8, %p1459_p1 }
  0x3f   : > { %1469 = shalt.err (!%p1466_p9)
}
  0x40   : > { %1272 = dma.hbm_to_vmem [thread:$0]  (!%p1270_p7), %s1728_s0, 128, %s228_s27, [#allocation6], %s1536_s29, %s1536_s29, %s1537_s30  }
  0x41   : > { %239 = sbr.rel (%p1605_p4) target bundleno = 1414 (0x586), region = 36 }
  0x46   : > { %1507 = dma.done.wait (%p1599_p3), [#allocation6], 128  }
  0x47   : > { %1509 = vsyncadd (%p1599_p3), [#allocation6], 4294967168 }
  0x48   : > { %1511 = dma.done.wait (%p1599_p3), [#allocation9], 2944  }
  0x49   : > { %1513 = vsyncadd (%p1599_p3), [#allocation9], 4294964352 }
  0x4a   : > { %1515 = dma.done.wait (%p1599_p3), [#allocation12], 384  }
  0x4b   : > { %1517 = vsyncadd (%p1599_p3), [#allocation12], 4294966912  ;;  %p288_p4 = scmp.eq.s32.totalorder %s1524_s15, 0 }
  0x4c   : > { %v1542_v0 = vmov (%p288_p4), 0.0  }
  0x4d   : > { %293 = sbr.rel (!%p288_p4) target bundleno = 82 (0x52), region = 56  ;;  %294 = vst [vmem:[#allocation4] sm:$0xf] (%p288_p4), %v1542_v0 }
  0x52 PF: > { %p1092_p6 = scmp.ne.s32.totalorder %s1524_s15, 0 }
  0x54   : > { %297 = sbr.rel (%p1092_p6) target bundleno = 314 (0x13a), region = 60 }
  0x59   : > { %v1331_v1 = vld [vmem:[#allocation8 + $0x8] sm:$0xff]   ;;  %v1543_v2 = vmov 0.0   ;;  %v1332_v3 = vld [vmem:[#allocation8] sm:$0xff]   ;;  %vm1544_vm0 = vmmov 0   ;;  %v1333_v4 = vld [vmem:[#allocation5] sm:$0xff]   ;;  %vm321_vm1 = vcmask 261120  }
  0x5a   : > { %1171 = vmatprep.subr.bf16.mxu0 %v1543_v2  ;;  %1175 = vmatprep.mubr.msk.bf16.mxu0 %vm1544_vm0, %v1543_v2  ;;  %v366_v23 = vld [vmem:[#allocation4] sm:$0x1]  ;;  %v376_v26 = vld [vmem:[#allocation4 + $0x1] sm:$0x1] }
  0x5b   : > { %1172 = vmatpush3.bf16.msra.mxu0 %v1331_v1 }
  0x5c   : > { %1173 = vmatprep.subr.bf16.mxu0 %v1543_v2 }
  0x5f   : > { %1174 = vmatpush3.bf16.msra.mxu0 %v1332_v3 }
  0x62   : > { %1176 = vmatmul.mubr.msk.bf16.vlgmr.msra.gmra.mxu0 %vm321_vm1, %v1333_v4 }
 0x122   : > { %v359_v5 = vpop.f32.mrf.mxu0 }
 0x123   : > { %v377_v8 = vmul.f32 %v359_v5, %v359_v5 }
 0x124   : > { %v1177_v6 = vpop.f32.mrf.mxu0 }
 0x126   : > { %v362_v7 = vpop.f32.mrf.mxu0 }
 0x127   : > { %v367_v9 = vadd.f32 %v362_v7, %v359_v5  ;;  %v378_v10 = vmul.f32 %v362_v7, %v362_v7  ;;  %v1136_v11 = vpack.c.bf16 %v362_v7, %v359_v5 }
 0x128   : > { %v1178_v12 = vpop.f32.mrf.mxu0 }
 0x129   : > { %v368_v13 = vrot.slane %v367_v9, 4  ;;  %v379_v14 = vadd.f32 %v378_v10, %v377_v8  ;;  %1137 = vst [vmem:[#allocation2] sm:$0xff] %v1136_v11  }
 0x12b   : > { %v369_v15 = vadd.f32 %v368_v13, %v367_v9  ;;  %v380_v16 = vrot.slane %v379_v14, 4 }
 0x12d   : > { %v370_v17 = vrot.slane %v369_v15, 2  ;;  %v381_v18 = vadd.f32 %v380_v16, %v379_v14 }
 0x12f   : > { %v371_v19 = vadd.f32 %v370_v17, %v369_v15  ;;  %v382_v20 = vrot.slane %v381_v18, 2 }
 0x131   : > { %v372_v21 = vrot.slane %v371_v19, 1  ;;  %v383_v22 = vadd.f32 %v382_v20, %v381_v18 }
 0x133   : > { %v373_v24 = vadd.f32 %v372_v21, %v371_v19  ;;  %v384_v25 = vrot.slane %v383_v22, 1 }
 0x135   : > { %v374_v27 = vadd.f32 %v373_v24, %v366_v23  ;;  %v385_v28 = vadd.f32 %v384_v25, %v383_v22 }
 0x137   : > { %375 = vst [vmem:[#allocation4] sm:$0x1] %v374_v27  ;;  %v386_v29 = vadd.f32 %v385_v28, %v376_v26 }
 0x139   : > { %387 = vst [vmem:[#allocation4 + $0x1] sm:$0x1] %v386_v29 }
 0x13a PF: > { %p1099_p3 = scmp.ne.s32.totalorder %s1524_s15, 1 }
 0x13c   : > { %405 = sbr.rel (%p1099_p3) target bundleno = 974 (0x3ce), region = 64 }
 0x141   : > { %v1334_v30 = vld [vmem:[#allocation10 + $0x38] sm:$0xff]   ;;  %v1545_v31 = vmov 0.0   ;;  %v1335_v32 = vld [vmem:[#allocation10 + $0x30] sm:$0xff]   ;;  %vm1546_vm2 = vmmov 0   ;;  %v1336_v33 = vld [vmem:[#allocation10 + $0x28] sm:$0xff]   ;;  %v427_v48 = vlaneseq  ;;  %vm698_vm3 = vcmask 523264  }
 0x142   : > { %1179 = vmatprep.subr.bf16.mxu0 %v1545_v31  ;;  %1199 = vmatprep.subr.bf16.mxu1 %v1545_v31  ;;  %v406_v34 = vld [vmem:[#allocation4] sm:$0x1]  ;;  %v408_v35 = vld [vmem:[#allocation4 + $0x1] sm:$0x1]  ;;  %v1337_v36 = vld [vmem:[#allocation10 + $0x20] sm:$0xff]   ;;  %vm744_vm4 = vcmask 261120  }
 0x143   : > { %1180 = vmatpush3.bf16.msra.mxu0 %v1334_v30  ;;  %1195 = vmatprep.mubr.msk.bf16.mxu0 %vm1546_vm2, %v1545_v31  ;;  %v407_v37 = vmul.f32 0.125, %v406_v34  ;;  %v409_v38 = vmul.f32 0.125, %v408_v35  ;;  %v1342_v39 = vld [vmem:[#allocation10 + $0x78] sm:$0xff]   ;;  %v1343_v41 = vld [vmem:[#allocation10 + $0x70] sm:$0xff]   ;;  %v1344_v44 = vld [vmem:[#allocation10 + $0x68] sm:$0xff]   ;;  %v428_v51 = vshrl.u32 %v427_v48, 7 }
 0x144   : > { %1181 = vmatprep.subr.bf16.mxu0 %v1545_v31  ;;  %1215 = vmatprep.mubr.msk.bf16.mxu1 %vm1546_vm2, %v1545_v31  ;;  %v1338_v43 = vld [vmem:[#allocation10 + $0x18] sm:$0xff]   ;;  %v1339_v46 = vld [vmem:[#allocation10 + $0x10] sm:$0xff]   ;;  %v1345_v47 = vld [vmem:[#allocation10 + $0x60] sm:$0xff]   ;;  %vm771_vm5 = vcmask 253952  }
 0x145   : > { %v410_v40 = vmul.f32 %v407_v37, %v407_v37  ;;  %1200 = vmatpush3.bf16.msra.mxu1 %v1342_v39  ;;  %v1340_v49 = vld [vmem:[#allocation10 + $0x8] sm:$0xff]   ;;  %v1346_v50 = vld [vmem:[#allocation10 + $0x58] sm:$0xff]   ;;  %v1341_v52 = vld [vmem:[#allocation10] sm:$0xff]   ;;  %v429_v55 = vsub.s32 0, %v428_v51 }
 0x146   : > { %1201 = vmatprep.subr.bf16.mxu1 %v1545_v31  ;;  %v414_v53 = vld [vmem:[#allocation11] sm:$0x1]  ;;  %v416_v60 = vld [vmem:[#allocation11 + $0x1] sm:$0x1]  ;;  %v1347_v6 = vld [vmem:[#allocation10 + $0x50] sm:$0xff]  }
 0x147   : > { %1182 = vmatpush3.bf16.msra.mxu0 %v1335_v32  ;;  %v411_v42 = vsub.f32 %v409_v38, %v410_v40  ;;  %v1139_v54 = vld [vmem:[#allocation2] sm:$0xff]   ;;  %v1350_v9 = vld [vmem:[#allocation10 + $0x98] sm:$0xff]   ;;  %v1351_v20 = vld [vmem:[#allocation10 + $0x90] sm:$0xff]  }
 0x148   : > { %1183 = vmatprep.subr.bf16.mxu0 %v1545_v31  ;;  %v1140_v58 = vunpack.c.l.bf16 %v1139_v54  ;;  %v1141_v59 = vunpack.c.h.bf16 %v1139_v54  ;;  %v1348_v7 = vld [vmem:[#allocation10 + $0x48] sm:$0xff]   ;;  %v1349_v8 = vld [vmem:[#allocation10 + $0x40] sm:$0xff]  }
 0x149   : > { %v412_v45 = vadd.f32 1e-05, %v411_v42  ;;  %1202 = vmatpush3.bf16.msra.mxu1 %v1343_v41  ;;  %v1100_v10 = vld [vmem:[#allocation11 + $0x2] ss:$0 sm:$0xff]  ;;  %v1353_v22 = vld [vmem:[#allocation10 + $0x80] sm:$0xff]  }
 0x14a   : > { %1203 = vmatprep.subr.bf16.mxu1 %v1545_v31  ;;  %v1352_v21 = vld [vmem:[#allocation10 + $0x88] sm:$0xff]  }
 0x14b   : > { %1184 = vmatpush3.bf16.msra.mxu0 %v1336_v33  ;;  %1354 = vrsqrt.f32 %v412_v45  ;;  %v1109_v23 = vld [vmem:[#allocation11 + $0x3] ss:$0 sm:$0xff] }
 0x14c   : > { %1185 = vmatprep.subr.bf16.mxu0 %v1545_v31 }
 0x14d   : > { %1204 = vmatpush3.bf16.msra.mxu1 %v1344_v44 }
 0x14e   : > { %1205 = vmatprep.subr.bf16.mxu1 %v1545_v31 }
 0x14f   : > { %1186 = vmatpush3.bf16.msra.mxu0 %v1337_v36 }
 0x150   : > { %1187 = vmatprep.subr.bf16.mxu0 %v1545_v31 }
 0x151   : > { %1206 = vmatpush3.bf16.msra.mxu1 %v1345_v47 }
 0x152   : > { %1207 = vmatprep.subr.bf16.mxu1 %v1545_v31 }
 0x153   : > { %1188 = vmatpush3.bf16.msra.mxu0 %v1338_v43 }
 0x154   : > { %1189 = vmatprep.subr.bf16.mxu0 %v1545_v31 }
 0x155   : > { %1208 = vmatpush3.bf16.msra.mxu1 %v1346_v50 }
 0x156   : > { %1209 = vmatprep.subr.bf16.mxu1 %v1545_v31 }
 0x157   : > { %1190 = vmatpush3.bf16.msra.mxu0 %v1339_v46 }
 0x158   : > { %1191 = vmatprep.subr.bf16.mxu0 %v1545_v31  ;;  %v1355_v56 = vpop.eup %1354 }
 0x159   : > { %v415_v57 = vmul.f32 %v1355_v56, %v414_v53  ;;  %1210 = vmatpush3.bf16.msra.mxu1 %v1347_v6 }
 0x15a   : > { %1211 = vmatprep.subr.bf16.mxu1 %v1545_v31 }
 0x15b   : > { %1192 = vmatpush3.bf16.msra.mxu0 %v1340_v49  ;;  %v417_v61 = vmul.f32 %v415_v57, %v407_v37  ;;  %v430_v62 = vrot.slane %v415_v57, %v429_v55  ;;  %v760_v49 = vld [vmem:[#allocation4 + $0x2] sm:$0x1] }
 0x15c   : > { %1193 = vmatprep.subr.bf16.mxu0 %v1545_v31 }
 0x15d   : > { %v418_v63 = vsub.f32 %v416_v60, %v417_v61  ;;  %v431_v0 = vmul.f32 %v1140_v58, %v430_v62  ;;  %v432_v1 = vmul.f32 %v1141_v59, %v430_v62  ;;  %1212 = vmatpush3.bf16.msra.mxu1 %v1348_v7 }
 0x15e   : > { %1213 = vmatprep.subr.bf16.mxu1 %v1545_v31 }
 0x15f   : > { %1194 = vmatpush3.bf16.msra.mxu0 %v1341_v52  ;;  %v436_v2 = vrot.slane %v418_v63, %v429_v55  ;;  %v773_v52 = vld [vmem:[#allocation4 + $0x3] sm:$0x1] }
 0x160   : > { %1219 = vmatprep.subr.bf16.mxu0 %v1545_v31 }
 0x161   : > { %v437_v3 = vadd.f32 %v436_v2, %v431_v0  ;;  %v438_v4 = vadd.f32 %v436_v2, %v432_v1  ;;  %1214 = vmatpush3.bf16.msra.mxu1 %v1349_v8 }
 0x163   : > { %v439_v5 = vpack.c.bf16 %v438_v4, %v437_v3 }
 0x165   : > { %1196 = vmatmul.mubr.bf16.vlgmr.msra.gmra.mxu0 %v439_v5 }
 0x166   : > { %1227 = vmatprep.mubr.msk.bf16.mxu0 %vm1546_vm2, %v1545_v31  ;;  %1220 = vmatpush3.bf16.msra.mxu0 %v1350_v9 }
 0x167   : > { %1221 = vmatprep.subr.bf16.mxu0 %v1545_v31 }
 0x16a   : > { %1222 = vmatpush3.bf16.msra.mxu0 %v1351_v20 }
 0x16b   : > { %1223 = vmatprep.subr.bf16.mxu0 %v1545_v31 }
 0x16e   : > { %1224 = vmatpush3.bf16.msra.mxu0 %v1352_v21 }
 0x16f   : > { %1225 = vmatprep.subr.bf16.mxu0 %v1545_v31 }
 0x172   : > { %1226 = vmatpush3.bf16.msra.mxu0 %v1353_v22 }
 0x225   : > { %v543_v11 = vpop.f32.mrf.mxu0 }
 0x226   : > { %v544_v13 = vadd.f32 %v1100_v10, %v543_v11 }
 0x227   : > { %v1197_v12 = vpop.f32.mrf.mxu0 }
 0x228   : > { %v550_v17 = vmax.f32 %v544_v13, 0.0 }
 0x229   : > { %v546_v14 = vpop.f32.mrf.mxu0 }
 0x22a   : > { %v547_v15 = vadd.f32 %v1100_v10, %v546_v14 }
 0x22b   : > { %v1198_v16 = vpop.f32.mrf.mxu0 }
 0x22c   : > { %v551_v18 = vmax.f32 %v547_v15, 0.0 }
 0x22e   : > { %v552_v19 = vpack.c.bf16 %v551_v18, %v550_v17 }
 0x230   : > { %1216 = vmatmul.mubr.bf16.vlgmr.msra.gmra.mxu1 %v552_v19 }
 0x2f0   : > { %v656_v24 = vpop.f32.mrf.mxu1 }
 0x2f1   : > { %v657_v26 = vadd.f32 %v1109_v23, %v656_v24 }
 0x2f2   : > { %v1217_v25 = vpop.f32.mrf.mxu1 }
 0x2f3   : > { %v663_v30 = vmax.f32 %v657_v26, 0.0 }
 0x2f4   : > { %v659_v27 = vpop.f32.mrf.mxu1 }
 0x2f5   : > { %v660_v28 = vadd.f32 %v1109_v23, %v659_v27 }
 0x2f6   : > { %v1218_v29 = vpop.f32.mrf.mxu1 }
 0x2f7   : > { %v664_v32 = vmax.f32 %v660_v28, 0.0 }
 0x2f9   : > { %v665_v33 = vpack.c.bf16 %v664_v32, %v663_v30 }
 0x2fb   : > { %1228 = vmatmul.mubr.msk.bf16.vlgmr.msra.gmra.mxu0 %vm698_vm3, %v665_v33 }
 0x3bb   : > { %v736_v34 = vpop.f32.mrf.mxu0 }
 0x3bc   : > { %745 = vst.msk [vmem:[#allocation3] sm:$0xff] %vm744_vm4, %v736_v34  ;;  %v761_v35 = vsel %vm744_vm4, %v736_v34, 0.0  ;;  %v774_v36 = vmul.f32 %v736_v34, %v736_v34 }
 0x3bd   : > { %v764_v31 = vrot.slane %v761_v35, 4  ;;  %v1229_v37 = vpop.f32.mrf.mxu0 }
 0x3be   : > { %v776_v38 = vsel %vm744_vm4, %v774_v36, 0.0 }
 0x3bf   : > { %v765_v39 = vadd.f32 %v764_v31, %v761_v35  ;;  %v779_v40 = vrot.slane %v776_v38, 4  ;;  %v739_v41 = vpop.f32.mrf.mxu0 }
 0x3c0   : > { %746 = vst.msk [vmem:[#allocation3 + $0x8] sm:$0xff] %vm744_vm4, %v739_v41 }
 0x3c1   : > { %v766_v42 = vrot.slane %v765_v39, 2  ;;  %v780_v43 = vadd.f32 %v779_v40, %v776_v38  ;;  %v1230_v44 = vpop.f32.mrf.mxu0 }
 0x3c3   : > { %v767_v45 = vadd.f32 %v766_v42, %v765_v39  ;;  %v781_v46 = vrot.slane %v780_v43, 2 }
 0x3c5   : > { %v768_v47 = vrot.slane %v767_v45, 1  ;;  %v782_v48 = vadd.f32 %v781_v46, %v780_v43 }
 0x3c7   : > { %v769_v50 = vadd.f32 %v768_v47, %v767_v45  ;;  %v783_v51 = vrot.slane %v782_v48, 1 }
 0x3c9   : > { %v770_v53 = vadd.f32 %v769_v50, %v760_v49  ;;  %v784_v54 = vadd.f32 %v783_v51, %v782_v48 }
 0x3cb   : > { %772 = vst.msk [vmem:[#allocation4 + $0x2] sm:$0x1] %vm771_vm5, %v770_v53  ;;  %v785_v55 = vadd.f32 %v784_v54, %v773_v52 }
 0x3cd   : > { %786 = vst.msk [vmem:[#allocation4 + $0x3] sm:$0x1] %vm771_vm5, %v785_v55 }
 0x3ce PF: > { %p1123_p12 = scmp.ne.s32.totalorder %s1524_s15, 2 }
 0x3d0   : > { %790 = sbr.rel (%p1123_p12) target bundleno = 1401 (0x579), region = 68 }
 0x3d5   : > { %v791_v56 = vld [vmem:[#allocation4 + $0x2] sm:$0x1]  ;;  %v793_v57 = vld [vmem:[#allocation4 + $0x3] sm:$0x1]  ;;  %v807_v63 = vlaneseq  ;;  %v799_v1 = vld [vmem:[#allocation11 + $0x4] sm:$0x1] }
 0x3d6   : > { %v792_v58 = vmul.f32 0.125, %v791_v56  ;;  %v794_v59 = vmul.f32 0.125, %v793_v57  ;;  %v801_v5 = vld [vmem:[#allocation11 + $0x5] sm:$0x1]  ;;  %v806_v9 = vld [vmem:[#allocation3 + $0x8] sm:$0xff]  ;;  %v1547_v16 = vmov 0.0  }
 0x3d7   : > { %v808_v0 = vshrl.u32 %v807_v63, 7  ;;  %v805_v6 = vld [vmem:[#allocation3] sm:$0xff]  ;;  %1231 = vmatprep.subr.bf16.mxu0 %v1547_v16  ;;  %vm1548_vm6 = vmmov 0   ;;  %v1549_v18 = vmov 0   ;;  %v856_v19 = vld [vmem:[#allocation11 + $0x10] sm:$0xff]  ;;  %v1550_v20 = vmov 1  }
 0x3d8   : > { %v795_v60 = vmul.f32 %v792_v58, %v792_v58  ;;  %1235 = vmatprep.mubr.msk.bf16.mxu0 %vm1548_vm6, %v1547_v16  ;;  %v855_v17 = vld [vmem:[#allocation11 + $0x8] sm:$0xff]  ;;  %1356 = vset.pattern.permute.xlu1 %v1549_v18  ;;  %v939_v21 = vld [vmem:[#allocation11 + $0x6] sm:$0x1]  ;;  %v1361_v28 = vld [vmem:[#allocation10 + $0xa0] sm:$0xff]   ;;  %vm872_vm7 = vcmask 261120   ;;  %vm929_vm8 = vcmask 130048  }
 0x3d9   : > { %v809_v2 = vsub.s32 0, %v808_v0  ;;  %859 = vperm.xlu1 %1356, %v855_v17   ;;  %vm950_vm9 = vcmask 122880  }
 0x3da   : > { %v796_v61 = vsub.f32 %v794_v59, %v795_v60 }
 0x3dc   : > { %v797_v62 = vadd.f32 1e-05, %v796_v61 }
 0x3dd   : > { %864 = vperm.xlu1 %1356, %v856_v19  }
 0x3de   : > { %1362 = vrsqrt.f32 %v797_v62 }
 0x3e1   : > { %1358 = vset.pattern.permute.xlu1 %v1550_v20 }
 0x3e2   : > { %924 = vperm.xlu1 %1358, %v856_v19  }
 0x3e6   : > { %1359 = vset.pattern.permute.xlu1 %v1549_v18 }
 0x3e7   : > { %942 = vperm.xlu1 %1359, %v939_v21  }
 0x3eb   : > { %v1363_v3 = vpop.eup %1362 }
 0x3ec   : > { %v800_v4 = vmul.f32 %v1363_v3, %v799_v1 }
 0x3ee   : > { %v802_v7 = vmul.f32 %v800_v4, %v792_v58  ;;  %v810_v8 = vrot.slane %v800_v4, %v809_v2 }
 0x3f0   : > { %v803_v10 = vsub.f32 %v801_v5, %v802_v7  ;;  %v811_v11 = vmul.f32 %v810_v8, %v805_v6  ;;  %v812_v13 = vmul.f32 %v810_v8, %v806_v9 }
 0x3f2   : > { %v816_v12 = vrot.slane %v803_v10, %v809_v2 }
 0x3f4   : > { %v817_v14 = vadd.f32 %v816_v12, %v811_v11  ;;  %v818_v15 = vadd.f32 %v816_v12, %v812_v13 }
 0x3f6   : > { %819 = vxpose.xlu0.b32.start [1/2] (short) (narrow) %v817_v14, 32 }
 0x3fa   : > { %820 = vxpose.xlu0.b32.end [2/2] (short) (narrow) %v818_v15, 32 }
 0x423   : > { %1357 = vset.pattern.permute.xlu0 %v1550_v20 }
 0x42b   : > { %920 = vperm.xlu0 %1357, %v855_v17  }
 0x42f   : > { %1360 = vset.pattern.permute.xlu0 %v1549_v18 }
 0x454   : > { %v860_v29 = vpop.permute.xlu1 %859 }
 0x458   : > { %v865_v33 = vpop.permute.xlu1 %864 }
 0x45d   : > { %v925_v39 = vpop.permute.xlu1 %924 }
 0x462   : > { %v943_v51 = vpop.permute.xlu1 %942 }
 0x472   : > { %v835_v22 = vpop.trf.xlu0 }
 0x476   : > { %v836_v23 = vpop.trf.xlu0 }
 0x477   : > { %v851_v27 = vpack.c.bf16 %v836_v23, %v835_v22 }
 0x47a   : > { %v837_v24 = vpop.trf.xlu0 }
 0x47e   : > { %v838_v25 = vpop.trf.xlu0 }
 0x47f   : > { %v852_v26 = vpack.c.bf16 %v838_v25, %v837_v24 }
 0x481   : > { %1232 = vmatpush3.bf16.msra.mxu0 %v852_v26 }
 0x482   : > { %1233 = vmatprep.subr.bf16.mxu0 %v1547_v16 }
 0x485   : > { %1234 = vmatpush3.bf16.msra.mxu0 %v851_v27 }
 0x488   : > { %1236 = vmatmul.mubr.msk.bf16.vlgmr.msra.gmra.mxu0 %vm872_vm7, %v1361_v28 }
 0x4a6   : > { %v921_v31 = vpop.permute.xlu0 %920 }
 0x548   : > { %v910_v30 = vpop.f32.mrf.mxu0 }
 0x549   : > { %v911_v32 = vadd.f32 %v910_v30, %v860_v29 }
 0x54a   : > { %v1237_v34 = vpop.f32.mrf.mxu0 }
 0x54b   : > { %v917_v35 = vmax.f32 %v911_v32, 0.0 }
 0x54c   : > { %v913_v36 = vpop.f32.mrf.mxu0 }
 0x54d   : > { %v914_v37 = vadd.f32 %v913_v36, %v865_v33  ;;  %v927_v41 = vmul.f32 %v921_v31, %v917_v35 }
 0x54e   : > { %v1238_v38 = vpop.f32.mrf.mxu0 }
 0x54f   : > { %v918_v40 = vmax.f32 %v914_v37, 0.0  ;;  %v930_v43 = vsel %vm929_vm8, %v927_v41, 0.0 }
 0x551   : > { %v928_v42 = vmul.f32 %v925_v39, %v918_v40 }
 0x553   : > { %v931_v44 = vsel %vm929_vm8, %v928_v42, 0.0 }
 0x554   : > { %v932_v45 = vadd.f32 %v931_v44, %v930_v43 }
 0x556   : > { %v933_v46 = vrot.slane %v932_v45, 4 }
 0x558   : > { %v934_v47 = vadd.f32 %v933_v46, %v932_v45 }
 0x55a   : > { %v935_v48 = vrot.slane %v934_v47, 2 }
 0x55c   : > { %v936_v49 = vadd.f32 %v935_v48, %v934_v47 }
 0x55e   : > { %v937_v50 = vrot.slane %v936_v49, 1 }
 0x560   : > { %v938_v52 = vadd.f32 %v937_v50, %v936_v49 }
 0x562   : > { %v945_v53 = vadd.f32 %v943_v51, %v938_v52 }
 0x564   : > { %v946_v54 = vmul.f32 0.5, %v945_v53 }
 0x566   : > { %1364 = vtanh.f32 %v946_v54 }
 0x573   : > { %v1365_v55 = vpop.eup %1364 }
 0x574   : > { %v948_v56 = vmul.f32 0.5, %v1365_v55 }
 0x576   : > { %v949_v57 = vadd.f32 0.5, %v948_v56 }
 0x578   : > { %951 = vst.msk [vmem:[#allocation13] sm:$0x1] %vm950_vm9, %v949_v57 }
 0x579 PF: > { %p1705_p10 = scmp.eq.s32.totalorder %s1078_s18, 2  ;;  %s1551_s21 = smov [#allocation13]  }
 0x57a   : > { %s967_s22 = sshll.u32 %s1551_s21, 4  ;;  %s968_s22 = int_to_ptr.vmem [resolvable:$true] %s967_s22 }
 0x57b   : > { %s1470_s29 = scalar_lea.vmem %s968_s22, 16  ;;  %s1476_s30 = scalar_lea.vmem %s968_s22, 32 }
 0x57c   : > { %p1471_p7 = scmp.ne.s32.totalorder %s968_s22, %s1470_s29  ;;  %p1477_p0 = scmp.lt.s32.totalorder %s968_s22, %s968_s22 }
 0x57d   : > { %p1478_p1 = scmp.lt.s32.totalorder %s1476_s30, %s1470_s29 }
 0x57e   : > { %p1472_p11 = pnand %p1471_p7, %p1705_p10 }
 0x57f   : > { %p1479_p2 = por %p1478_p1, %p1477_p0 }
 0x580   : > { %p1473_p13 = pneg %p1472_p11 }
 0x582   : > { %p1480_p5 = pnand %p1479_p2, %p1473_p13 }
 0x584   : > { %1483 = shalt.err (!%p1480_p5)
}
 0x585   : > { %1256 = dma.vmem_to_hbm [thread:$0]  (%p1705_p10), %s968_s22, 16, %s1732_s4, [#allocation7]  }
 0x586 PF: > { %p1287_p8 = scmp.ge.s32.totalorder %s1532_s17, 2  ;;  %p1288_p9 = scmp.eq.s32.totalorder %s1079_s19, 2 }
 0x588   : > { %p1274_p4 = pnand %p1288_p9, %p1287_p8 }
 0x58a   : > { %p1275_p6 = pneg %p1274_p4 }
 0x58c   : > { %1519 = dma.done.wait (%p1275_p6), [#allocation7], 16  }
 0x58d   : > { %1521 = vsyncadd (%p1275_p6), [#allocation7], 4294967280  ;;  %s22_s17 = sadd.s32 1, %s1532_s17   ;;  %s1737_s15 = smov %s1528_s16 }
 0x58e   : > { %p19_p3 = scmp.ge.s32.totalorder %s22_s17, 5   ;;  %s1738_s16 = smov %s1740_s20 }
 0x590   :  { %21 = sbr.rel (!%p19_p3) target bundleno = 7 (0x7), region = 113 }
 0x595   :  { %984 = vsyncpa [#allocation6], 1 }
 0x596   :  { %986 = vsyncpa [#allocation6 + $0x1], 1 }
 0x597   :  { %987 = vsyncpa [#allocation9], 1 }
 0x598   :  { %988 = vsyncpa [#allocation12], 1 }
 0x599   :  { %989 = vsyncpa [#allocation7], 1 }
 0x59a   :  { %991 = vsyncpa [#allocation7 + $0x1], 1 }

</bundles_post_ra>
